<compile_context>
chip_gen: v7x
topology: tpu7x:2x2x1
jax: 0.10.0
libtpu: 0.0.40
codegen_flags: <defaults>
</compile_context>

<pallas_src>
import math

import jax
import jax.numpy as jnp
from jax.experimental import pallas as pl
from jax.experimental.pallas import tpu as pltpu

_SCALE = 1.999 * math.pi
_LANES = 128
_SUBLANES = 8
_MAX_BLOCK_ROWS = 1024   # plateau of the mem-bound tiling curve; small VMEM footprint
_MIN_GRID = 8            # keep pipelining active and both v7x TCs busy


def _int2phase_kernel(x_ref, o_ref):
    # x_ref:  (block_rows, 128)  f32
    # o_ref:  (block_rows, 256)  f32 -- cos in lanes 0-127, sin in lanes 128-255
    phase = x_ref[...] * _SCALE
    o_ref[:, :_LANES] = jnp.cos(phase)
    o_ref[:, _LANES:] = jnp.sin(phase)
    # TODO(synk): the torch forward print()s the full phase tensor; full-tensor
    # printing has no clean in-kernel equivalent (pl.debug_print is scalar-only).


def _round_up(n, m):
    return ((n + m - 1) // m) * m


def nonlinear_int2phase_for_dmd(input_field, *, return_pair=False):
    """JAX/Pallas equivalent of NonLinear_Int2Phase_for_DMD.forward.

    input_field: array of any shape (e.g. NCHW); cast to float32.
    returns: complex64 array of the same shape, or (re, im) float32 pair if
             return_pair=True (lets a downstream consumer avoid the extra
             complex-materialization HBM pass).
    """
    x = jnp.asarray(input_field, dtype=jnp.float32)
    orig_shape = x.shape
    total = x.size

    # Lane-dense [rows, 128] slab. Only pad when total isn't lane-aligned.
    rows = -(-total // _LANES)                     # ceil(total / 128)
    padded_total = rows * _LANES
    flat = x.reshape(-1)
    if padded_total != total:
        flat = jnp.pad(flat, (0, padded_total - total))
    slab = flat.reshape(rows, _LANES)

    # Block sizing: aim for >= _MIN_GRID steps, cap at _MAX_BLOCK_ROWS, keep
    # the block sublane-aligned.  Ragged last block is masked by Pallas.
    block_rows = _round_up(-(-rows // _MIN_GRID), _SUBLANES)
    block_rows = max(_SUBLANES, min(block_rows, _MAX_BLOCK_ROWS,
                                    _round_up(rows, _SUBLANES)))
    grid_n = -(-rows // block_rows)

    out = pl.pallas_call(
        _int2phase_kernel,
        out_shape=jax.ShapeDtypeStruct((rows, 2 * _LANES), jnp.float32),
        grid_spec=pltpu.PrefetchScalarGridSpec(
            num_scalar_prefetch=0,
            grid=(grid_n,),
            in_specs=[pl.BlockSpec((block_rows, _LANES), lambda i: (i, 0))],
            out_specs=pl.BlockSpec((block_rows, 2 * _LANES), lambda i: (i, 0)),
        ),
        compiler_params=pltpu.CompilerParams(
            dimension_semantics=("parallel",),
        ),
        cost_estimate=pl.CostEstimate(
            flops=padded_total,
            transcendentals=2 * padded_total,
            bytes_accessed=12 * padded_total,
        ),
    )(slab)

    re = out[:, :_LANES]
    im = out[:, _LANES:]
    if padded_total != total:
        re = re.reshape(-1)[:total]
        im = im.reshape(-1)[:total]
    re = re.reshape(orig_shape)
    im = im.reshape(orig_shape)
    if return_pair:
        return re, im
    # Separate fused XLA pass; unavoidable when complex64 must be materialized
    # standalone (Pallas/Mosaic has no complex dtype).
    return jax.lax.complex(re, im)


if __name__ == "__main__":
    key = jax.random.PRNGKey(0)

    # Small NCHW input consistent with an optical-field intensity map.
    x = jax.random.uniform(key, (2, 4, 16, 16), dtype=jnp.float32)
    out = jax.block_until_ready(nonlinear_int2phase_for_dmd(x))

    phase_ref = x * (1.999 * math.pi)
    ref = jax.lax.complex(jnp.cos(phase_ref), jnp.sin(phase_ref))
    assert out.shape == x.shape and out.dtype == jnp.complex64
    assert jnp.allclose(out, ref, atol=1e-5), "mismatch vs reference"

    # Unaligned shape to exercise the lane-pad + ragged-last-block path.
    x2 = jax.random.uniform(jax.random.PRNGKey(1), (3, 5, 7, 11), dtype=jnp.float32)
    out2 = jax.block_until_ready(nonlinear_int2phase_for_dmd(x2))
    phase2 = x2 * (1.999 * math.pi)
    ref2 = jax.lax.complex(jnp.cos(phase2), jnp.sin(phase2))
    assert out2.shape == x2.shape and out2.dtype == jnp.complex64
    assert jnp.allclose(out2, ref2, atol=1e-5), "mismatch vs reference (unaligned path)"

    # Fused-consumer path (no complex materialization pass).
    re, im = nonlinear_int2phase_for_dmd(x, return_pair=True)
    jax.block_until_ready((re, im))
    assert jnp.allclose(re, jnp.cos(phase_ref), atol=1e-5)
    assert jnp.allclose(im, jnp.sin(phase_ref), atol=1e-5)

    print("KERNEL_OK")
</pallas_src>

<mosaic_0001>
module attributes {stable_mosaic.version = 11 : i64} {
  func.func @_int2phase_kernel(%arg0: i32, %arg1: memref<8x128xf32, #tpu.memory_space<vmem>>, %arg2: memref<8x256xf32, #tpu.memory_space<vmem>>) attributes {dimension_semantics = [#tpu.dimension_semantics<parallel>], iteration_bounds = array<i64: 2>, scalar_prefetch = 0 : i64, scratch_operands = 0 : i64, tpu.core_type = #tpu.core_type<tc>, window_params = [{transform_indices = @transform_0, window_bounds = array<i64: 8, 128>}, {transform_indices = @transform_1, window_bounds = array<i64: 8, 256>}]} {
    %c0 = arith.constant 0 : index
    %c0_0 = arith.constant 0 : index
    %0 = vector.load %arg1[%c0, %c0_0] : memref<8x128xf32, #tpu.memory_space<vmem>>, vector<8x128xf32>
    %cst = arith.constant 6.2800436 : f32
    %1 = vector.broadcast %cst : f32 to vector<8x128xf32>
    %2 = arith.mulf %0, %1 : vector<8x128xf32>
    %3 = math.cos %2 : vector<8x128xf32>
    %c0_1 = arith.constant 0 : index
    %c0_2 = arith.constant 0 : index
    %4 = vector.load %arg2[%c0_1, %c0_2] : memref<8x256xf32, #tpu.memory_space<vmem>>, vector<8x128xf32>
    tpu.vector_store %arg2[%c0_1, %c0_2], %3 {strides = array<i32>} : memref<8x256xf32, #tpu.memory_space<vmem>>, vector<8x128xf32>,
    %5 = math.sin %2 : vector<8x128xf32>
    %c0_3 = arith.constant 0 : index
    %c128 = arith.constant 128 : index
    %6 = vector.load %arg2[%c0_3, %c128] : memref<8x256xf32, #tpu.memory_space<vmem>>, vector<8x128xf32>
    tpu.vector_store %arg2[%c0_3, %c128], %5 {strides = array<i32>} : memref<8x256xf32, #tpu.memory_space<vmem>>, vector<8x128xf32>,
    return
  }
  func.func @transform_0(%arg0: i32) -> (i32, i32) {
    %c0_i32 = arith.constant 0 : i32
    %c0_i32_0 = arith.constant 0 : i32
    return %arg0, %c0_i32 : i32, i32
  }
  func.func @transform_1(%arg0: i32) -> (i32, i32) {
    %c0_i32 = arith.constant 0 : i32
    %c0_i32_0 = arith.constant 0 : i32
    return %arg0, %c0_i32 : i32, i32
  }
}

</mosaic_0001>

<bundles_post_ra>
// kernel: tpu_custom_call.1
= control target key start
LH: loop header
LB: loop body
LE: loop exit
PB: predicated region body
PF: predicated region fallthrough
CT: control target
= control target key end

     0   :  { %6 = vsyncpa [#allocation3], 0  ;;  %s809_s0 = inlined_call_operand.hbm [shape: f32[16,128], index: 0, kind: input, shape index: {}]   ;;  %s810_s1 = inlined_call_operand.hbm [shape: f32[16,256], index: 1, kind: output, shape index: {}]  }
   0x1   :  { %8 = vsyncpa [#allocation3 + $0x1], 0 }
   0x2   :  { %9 = vsyncpa [#allocation4], 0 }
   0x3   :  { %11 = vsyncpa [#allocation4 + $0x1], 0  ;;  %s626_s6 = smov 0   ;;  %s628_s7 = smov 0  }
   0x4   :  { %s630_s8 = smov 0   ;;  %s632_s9 = smov 0  }
   0x5 LB: > { %s647_s10 = sadd.s32 4294967295, %s606_s9   ;;  %s428_s11 = sadd.s32 4294967294, %s606_s9   ;;  %s606_s9 = sphi %s632_s9, %s825_s9   ;;  %s602_s8 = sphi %s630_s8, %s824_s8   ;;  %s598_s7 = sphi %s628_s7, %s823_s7   ;;  %s594_s6 = sphi %s626_s6, %s822_s6  }
   0x6   : > { %s651_s12 = sadd.s32 1, %s606_s9   ;;  %s24_s13 = sadd.s32 1, %s602_s8 }
   0x7   : > { %s21_s14 = ssub.s32 %s606_s9, %s651_s12  ;;  %p31_p0 = scmp.ne.s32.totalorder %s602_s8, %s598_s7 }
   0x8   : > { %p22_p1 = scmp.eq.s32.totalorder %s21_s14, 0  ;;  %p32_p2 = scmp.eq.s32.totalorder %s606_s9, 0 }
   0x9   : > { %p37_p3 = scmp.ne.s32.totalorder %s598_s7, %s594_s6  ;;  %p38_p4 = scmp.eq.s32.totalorder %s647_s10, 0 }
   0xa   : > { %s663_s15 = scalar_select %p22_p1, %s602_s8, %s24_s13  }
   0xb   : > { %p665_p5 = por %p32_p2, %p31_p0  ;;  %p669_p6 = por %p38_p4, %p37_p3 }
   0xc   : > { %p61_p7 = scmp.eq.s32.totalorder %s647_s10, 1  ;;  %p67_p8 = scmp.eq.s32.totalorder %s428_s11, 1 }
   0xd   : > { %p466_p10 = scmp.lt.s32.totalorder %s606_s9, 2  ;;  %s87_s20 = sand.u32 1, %s602_s8  }
   0xe   : > { %p676_p11 = por %p61_p7, %p31_p0  ;;  %p680_p12 = por %p67_p8, %p37_p3 }
   0xf   : > { %s432_s21 = sshll.u32 %s606_s9, 7  ;;  %s431_s22 = sshll.u32 %s87_s20, 3 }
  0x10   : > { %s814_s18 = scalar_select %p676_p11, 1, 0 }
  0x11   : > { %s815_s19 = scalar_select %p680_p12, 1, 0 }
  0x12   : > { %s689_s25 = scalar_lea.hbm %s809_s0, %s432_s21  ;;  %s91_s26 = scalar_lea.vmem [#allocation2], %s431_s22 }
  0x13   : > { %s98_s27 = sshll.u32 %s91_s26, 4  ;;  %p693_p13 = pnand %p466_p10, %p665_p5  ;;  %s697_s27 = int_to_ptr.vmem [resolvable:$true] %s98_s27 }
  0x14   : > { %s88_s29 = scalar_lea.sflag [#allocation3], %s87_s20  ;;  %s510_s30 = scalar_lea.hbm %s689_s25, 128 }
  0x15   : > { %p511_p2 = scmp.ne.s32.totalorder %s689_s25, %s510_s30  ;;  %p512_p3 = pneg %p693_p13 }
  0x16   : > { %s515_s4 = scalar_lea.hbm %s809_s0, 256  ;;  %p516_p5 = scmp.lt.u32.totalorder %s689_s25, %s809_s0 }
  0x17   : > { %p513_p4 = pnand %p512_p3, %p511_p2  ;;  %p517_p8 = scmp.lt.u32.totalorder %s515_s4, %s510_s30 }
  0x18   : > { %p519_p9 = scmp.lt.u32.totalorder %s510_s30, %s689_s25 }
  0x19   : > { %p514_p7 = pneg %p513_p4  ;;  %p518_p10 = por %p517_p8, %p516_p5 }
  0x1b   : > { %p520_p0 = por %p519_p9, %p518_p10 }
  0x1d   : > { %p521_p1 = pnand %p520_p0, %p514_p7 }
  0x1f   : > { %524 = shalt.err (!%p521_p1)
}
  0x20   : > { %s525_s13 = scalar_lea.vmem %s697_s27, 128  ;;  %s608_s14 = smov [#allocation2]  }
  0x21   : > { %p526_p2 = scmp.ne.s32.totalorder %s697_s27, %s525_s13  ;;  %s530_s16 = sshll.u32 %s608_s14, 4  ;;  %s531_s16 = int_to_ptr.vmem [resolvable:$false] %s530_s16 }
  0x22   : > { %s532_s20 = scalar_lea.vmem %s531_s16, 256  ;;  %p533_p11 = scmp.lt.s32.totalorder %s697_s27, %s531_s16 }
  0x23   : > { %p528_p4 = pnand %p526_p2, %p512_p3  ;;  %p534_p5 = scmp.lt.s32.totalorder %s532_s20, %s525_s13 }
  0x25   : > { %p529_p12 = pneg %p528_p4  ;;  %p535_p8 = por %p534_p5, %p533_p11 }
  0x27   : > { %p536_p9 = pnand %p535_p8, %p529_p12 }
  0x29   : > { %539 = shalt.err (!%p536_p9)
}
  0x2a   : > { %461 = dma.hbm_to_vmem [thread:$0]  (!%p693_p13), %s689_s25, 128, %s697_s27, %s88_s29  }
  0x2b   : > { %p817_p0 = scmp.lt.s32.totalorder %s606_s9, 3  ;;  %p818_p1 = scmp.ge.s32.totalorder %s606_s9, 1 }
  0x2d   : > { %p104_p3 = pnand %p818_p1, %p817_p0 }
  0x2e   : > { %s731_s21 = sand.u32 (!%p104_p3), 1, %s598_s7  }
  0x2f   : > { %107 = sbr.rel (%p104_p3) target bundleno = 152 (0x98), region = 24  ;;  %s434_s22 = sshll.u32 (!%p104_p3), %s731_s21, 3 }
  0x30   : > { %s110_s23 = scalar_lea.sflag (!%p104_p3), [#allocation3], %s731_s21  ;;  %s113_s24 = scalar_lea.vmem (!%p104_p3), [#allocation2], %s434_s22 }
  0x36   : > { %585 = dma.done.wait (%p669_p6), %s110_s23, 128  }
  0x37   : > { %587 = vsyncadd (%p669_p6), %s110_s23, 4294967168  ;;  %v132_v0 = vld [vmem:[%s113_s24] sm:$0xff]  ;;  %v609_v13 = vmov 683565275   ;;  %v610_v15 = vmov 2475754826  }
  0x38   : > { %v739_v1 = vmul.f32 6.2800436, %v132_v0  ;;  %v611_v17 = vmov 2131351028   ;;  %v612_v19 = vmov 2102212464  }
  0x39   : > { %v613_v21 = vmov 920167782   ;;  %v614_v28 = vmov 1326507024   ;;  %s435_s17 = sshll.u32 %s731_s21, 4  ;;  %s449_s27 = sshll.u32 %s647_s10, 8 }
  0x3a   : > { %v137_v2 = vand.u32 2139095040, %v739_v1  ;;  %v134_v4 = vand.u32 2147483647, %v739_v1  ;;  %vm136_vm7 = vcmp.lt.s32.totalorder %v739_v1, 0  ;;  %s131_s25 = scalar_lea.vmem [#allocation5], %s435_s17  ;;  %vm226_vm15 = vweird.f32 %v739_v1  ;;  %s767_s30 = scalar_lea.hbm %s810_s1, %s449_s27 }
  0x3b   : > { %s358_s26 = sshll.u32 %s131_s25, 4  ;;  %s344_s10 = scalar_lea.sflag [#allocation4], %s731_s21  ;;  %s762_s26 = int_to_ptr.vmem [resolvable:$true] %s358_s26 }
  0x3c   : > { %v138_v3 = vshrl.u32 %v137_v2, 23  ;;  %v141_v7 = vand.u32 8388607, %v134_v4  ;;  %vm135_vm8 = vcmp.le.f32.partialorder %v134_v4, 0.7853982  ;;  %s540_s2 = scalar_lea.vmem %s762_s26, 256 }
  0x3d   : > { %p541_p6 = scmp.ne.s32.totalorder %s762_s26, %s540_s2  ;;  %p819_p11 = scmp.ne.s32.totalorder %s814_s18, 0 }
  0x3e   : > { %v436_v5 = vadd.s32 4294967169, %v138_v3  ;;  %v142_v10 = vor.u32 8388608, %v141_v7  ;;  %s615_s3 = smov [#allocation5]  }
  0x3f   : > { %p542_p12 = pnand %p541_p6, %p819_p11  ;;  %s544_s4 = sshll.u32 %s615_s3, 4  ;;  %s545_s4 = int_to_ptr.vmem [resolvable:$false] %s544_s4 }
  0x40   : > { %v144_v6 = vadd.s32 1, %v436_v5  ;;  %v182_v30 = vshll.u32 %v142_v10, 8  ;;  %s546_s5 = scalar_lea.vmem %s545_s4, 512  ;;  %p547_p7 = scmp.lt.s32.totalorder %s762_s26, %s545_s4 }
  0x41   : > { %p543_p13 = pneg %p542_p12  ;;  %p548_p10 = scmp.lt.s32.totalorder %s546_s5, %s540_s2 }
  0x42   : > { %vm145_vm0 = vcmp.gt.s32.totalorder %v144_v6, 0 }
  0x43   : > { %v146_v8 = vsel %vm145_vm0, %v144_v6, 0  ;;  %p549_p2 = por %p548_p10, %p547_p7 }
  0x44   : > { %v148_v9 = vand.u32 31, %v146_v8  ;;  %v147_v11 = vshrl.u32 %v146_v8, 5 }
  0x45   : > { %p550_p4 = pnand %p549_p2, %p543_p13 }
  0x46   : > { %v149_v12 = vsub.s32 32, %v148_v9  ;;  %v151_v14 = vshll.u32 %v609_v13, %v148_v9  ;;  %v154_v16 = vshll.u32 %v610_v15, %v148_v9  ;;  %v157_v18 = vshll.u32 %v611_v17, %v148_v9 }
  0x47   : > { %v160_v20 = vshll.u32 %v612_v19, %v148_v9  ;;  %v163_v22 = vshll.u32 %v613_v21, %v148_v9  ;;  %vm166_vm1 = vcmp.lt.s32.totalorder %v147_v11, 1  ;;  %vm169_vm2 = vcmp.lt.s32.totalorder %v147_v11, 4 }
  0x48   : > { %v150_v23 = vshrl.u32 %v609_v13, %v149_v12  ;;  %v152_v24 = vshrl.u32 %v610_v15, %v149_v12  ;;  %v155_v25 = vshrl.u32 %v611_v17, %v149_v12  ;;  %v158_v26 = vshrl.u32 %v612_v19, %v149_v12 }
  0x49   : > { %v161_v27 = vshrl.u32 %v613_v21, %v149_v12  ;;  %v164_v29 = vshrl.u32 %v614_v28, %v149_v12  ;;  %vm167_vm3 = vcmp.lt.s32.totalorder %v147_v11, 2  ;;  %vm168_vm4 = vcmp.lt.s32.totalorder %v147_v11, 3 }
  0x4a   : > { %v153_v31 = vor.u32 %v152_v24, %v151_v14  ;;  %v156_v32 = vor.u32 %v155_v25, %v154_v16  ;;  %v159_v33 = vor.u32 %v158_v26, %v157_v18 }
  0x4b   : > { %v162_v34 = vor.u32 %v161_v27, %v160_v20  ;;  %v165_v35 = vor.u32 %v164_v29, %v163_v22 }
  0x4c   : > { %v170_v36 = vsel %vm166_vm1, %v150_v23, %v153_v31  ;;  %v171_v37 = vsel %vm169_vm2, %v159_v33, 2102212464  ;;  %v174_v38 = vsel %vm166_vm1, %v153_v31, %v156_v32  ;;  %v178_v39 = vsel %vm166_vm1, %v156_v32, %v159_v33 }
  0x4d   : > { %v172_v40 = vsel %vm168_vm4, %v156_v32, %v171_v37  ;;  %v175_v41 = vsel %vm169_vm2, %v162_v34, 920167782  ;;  %v179_v42 = vsel %vm169_vm2, %v165_v35, 1326507024 }
  0x4e   : > { %v176_v43 = vsel %vm168_vm4, %v159_v33, %v175_v41  ;;  %v180_v44 = vsel %vm168_vm4, %v162_v34, %v179_v42  ;;  %v173_v45 = vsel %vm167_vm3, %v170_v36, %v172_v40 }
  0x4f   : > { %v177_v46 = vsel %vm167_vm3, %v174_v38, %v176_v43  ;;  %v181_v47 = vsel %vm167_vm3, %v178_v39, %v180_v44  ;;  %v189_v52 = vmul.u32 %v182_v30, %v173_v45 }
  0x50   : > { %v745_v48 = vmul.u32.u64.low %v182_v30, %v181_v47  ;;  %v746_v49 = vmul.u32.u64.high %v182_v30, %v181_v47, %v745_v48  ;;  %v748_v50 = vmul.u32.u64.low %v182_v30, %v177_v46  ;;  %v749_v51 = vmul.u32.u64.high %v182_v30, %v177_v46, %v748_v50 }
  0x52   : > { %vm191_vm5 = vc.u32 %v746_v49, %v748_v50  ;;  %v192_v53 = vadd.s32 1, %v749_v51  ;;  %v190_v0 = vadd.s32 %v748_v50, %v746_v49 }
  0x54   : > { %v193_v54 = vsel %vm191_vm5, %v192_v53, %v749_v51 }
  0x55   : > { %v194_v55 = vadd.s32 %v193_v54, %v189_v52 }
  0x57   : > { %v195_v56 = vadd.s32 536870912, %v194_v55 }
  0x59   : > { %v196_v57 = vshrl.u32 %v195_v56, 30 }
  0x5b   : > { %v197_v58 = vshll.u32 %v196_v57, 30  ;;  %v220_v14 = vsub.s32 4, %v196_v57 }
  0x5d   : > { %v198_v59 = vsub.s32 %v194_v55, %v197_v58  ;;  %v221_v17 = vsel %vm136_vm7, %v220_v14, %v196_v57 }
  0x5e   : > { %v223_v20 = vsel %vm135_vm8, 0, %v221_v17 }
  0x5f   : > { %v200_v60 = vsub.s32 0, %v198_v59  ;;  %v331_v21 = vadd.s32 3, %v223_v20  ;;  %v227_v22 = vand.u32 3, %v223_v20 }
  0x61   : > { %v437_v61 = vmin.u32 %v200_v60, %v198_v59  ;;  %v332_v23 = vand.u32 3, %v331_v21  ;;  %vm232_vm9 = vcmp.eq.s32.totalorder %v227_v22, 2  ;;  %vm229_vm11 = vcmp.eq.s32.totalorder %v227_v22, 0 }
  0x62   : > { %vm228_vm13 = vcmp.lt.s32.totalorder %v227_v22, 2 }
  0x63   : > { %v202_v62 = vclz %v437_v61  ;;  %vm337_vm10 = vcmp.eq.s32.totalorder %v332_v23, 2  ;;  %vm334_vm12 = vcmp.eq.s32.totalorder %v332_v23, 0  ;;  %vm333_vm14 = vcmp.lt.s32.totalorder %v332_v23, 2 }
  0x65   : > { %v438_v63 = vadd.s32 4294967294, %v202_v62 }
  0x67   : > { %vm439_vm6 = vcmp.lt.s32.totalorder %v438_v63, 0 }
  0x68   : > { %v205_v2 = vsel %vm439_vm6, 0, %v438_v63 }
  0x69   : > { %v206_v3 = vsub.s32 32, %v205_v2  ;;  %v207_v5 = vshll.u32 %v198_v59, %v205_v2  ;;  %v210_v6 = vsub.s32 4294967266, %v205_v2 }
  0x6b   : > { %v208_v7 = vshrl.u32 %v190_v0, %v206_v3  ;;  %v211_v8 = vadd.s32 127, %v210_v6 }
  0x6d   : > { %v209_v9 = vor.u32 %v208_v7, %v207_v5  ;;  %v212_v10 = vshll.u32 %v211_v8, 23 }
  0x6f   : > { %v213_v11 = vor.u32 4788187, %v212_v10  ;;  %v216_v12 = vcvt.s32.f32 %v209_v9 }
  0x71   : > { %v214_v13 = vand.u32 2147483647, %v213_v11 }
  0x73   : > { %v217_v15 = vmul.f32 %v216_v12, %v214_v13 }
  0x75   : > { %v218_v16 = vxor.u32 2147483648, %v217_v15 }
  0x77   : > { %v219_v18 = vsel %vm136_vm7, %v218_v16, %v217_v15 }
  0x78   : > { %v222_v19 = vsel %vm135_vm8, %v739_v1, %v219_v18 }
  0x79   : > { %506 = vcosq.f32 %v222_v19 }
  0x7a   : > { %508 = vsinq.f32 %v222_v19 }
  0x83   : > { %v507_v24 = vpop.eup %506 }
  0x84   : > { %v509_v25 = vpop.eup %508  ;;  %v233_v26 = vxor.u32 2147483648, %v507_v24 }
  0x85   : > { %v230_v4 = vxor.u32 2147483648, %v509_v25 }
  0x86   : > { %v234_v27 = vsel %vm232_vm9, %v233_v26, %v509_v25  ;;  %v339_v28 = vsel %vm337_vm10, %v233_v26, %v509_v25 }
  0x87   : > { %v231_v29 = vsel %vm229_vm11, %v507_v24, %v230_v4  ;;  %v336_v30 = vsel %vm334_vm12, %v507_v24, %v230_v4 }
  0x88   : > { %v235_v31 = vsel %vm228_vm13, %v231_v29, %v234_v27  ;;  %v340_v32 = vsel %vm333_vm14, %v336_v30, %v339_v28 }
  0x89   : > { %v236_v33 = vsel %vm226_vm15, nan, %v235_v31  ;;  %v341_v34 = vsel %vm226_vm15, nan, %v340_v32 }
  0x8a   : > { %237 = vst [vmem:[%s131_s25] sm:$0xff] %v236_v33  ;;  %342 = vst [vmem:[%s131_s25 + $0x8] sm:$0xff] %v341_v34 }
  0x8b   : > { %553 = shalt.err (!%p550_p4)
}
  0x8c   : > { %s554_s11 = scalar_lea.hbm %s767_s30, 256  ;;  %s558_s16 = scalar_lea.hbm %s810_s1, 512 }
  0x8d   : > { %p555_p5 = scmp.ne.s32.totalorder %s767_s30, %s554_s11  ;;  %p559_p0 = scmp.lt.u32.totalorder %s767_s30, %s810_s1 }
  0x8e   : > { %p560_p1 = scmp.lt.u32.totalorder %s558_s16, %s554_s11  ;;  %p562_p6 = scmp.lt.u32.totalorder %s554_s11, %s767_s30 }
  0x8f   : > { %p556_p8 = pnand %p555_p5, %p819_p11 }
  0x90   : > { %p561_p3 = por %p560_p1, %p559_p0 }
  0x91   : > { %p557_p9 = pneg %p556_p8 }
  0x92   : > { %p563_p12 = por %p562_p6, %p561_p3 }
  0x94   : > { %p564_p13 = pnand %p563_p12, %p557_p9 }
  0x96   : > { %567 = shalt.err (!%p564_p13)
}
  0x97   : > { %456 = dma.vmem_to_hbm [thread:$0]  (%p819_p11), %s762_s26, 256, %s767_s30, %s344_s10  }
  0x98 PF: > { %s370_s22 = sand.u32 1, %s594_s6   ;;  %p820_p7 = scmp.ne.s32.totalorder %s815_s19, 0 }
  0x99   : > { %p821_p10 = scmp.ge.s32.totalorder %s606_s9, 2  ;;  %s371_s23 = scalar_lea.sflag [#allocation4], %s370_s22 }
  0x9b   : > { %p463_p2 = pnand %p821_p10, %p820_p7 }
  0x9d   : > { %589 = dma.done.wait (!%p463_p2), %s371_s23, 256  }
  0x9e   : > { %591 = vsyncadd (!%p463_p2), %s371_s23, 4294967040  ;;  %p14_p4 = scmp.ge.s32.totalorder %s651_s12, 4   ;;  %s822_s6 = smov %s598_s7 }
  0x9f   : > { %s823_s7 = smov %s602_s8  ;;  %s824_s8 = smov %s663_s15 }
  0xa0   : > { %s825_s9 = smov %s651_s12  ;;  %16 = sbr.rel (!%p14_p4) target bundleno = 5 (0x5), region = 69 }
  0xa7   :  { %376 = vsyncpa [#allocation3], 1 }
  0xa8   :  { %378 = vsyncpa [#allocation3 + $0x1], 1 }
  0xa9   :  { %379 = vsyncpa [#allocation4], 1 }
  0xaa   :  { %381 = vsyncpa [#allocation4 + $0x1], 1 }

</bundles_post_ra>
